<compile_context>
chip_gen: v7x
topology: tpu7x:2x2x1
jax: 0.10.0
libtpu: 0.0.40
codegen_flags: <defaults>
</compile_context>

<pallas_src>
import functools
import math

import jax
import jax.numpy as jnp
from jax.experimental import pallas as pl
from jax.experimental.pallas import tpu as pltpu


def _make_conv_kernel(*, kh, sh, TR, Wo, K, Np, Cout, small_out):
    """Fused in-VMEM patch-build + GEMM + bias kernel (closure over config)."""
    M = TR * Wo

    def kernel(x_ref, w_ref, b_ref, o_ref):
        # x_ref: (1, 1, rows_in, Wo, kw*Cin)  row-halo tile, width-unrolled
        # w_ref: (K, Np)                      flattened weights, lane-padded N
        # b_ref: (1, Np)                      effective per-channel bias (f32)
        # o_ref: (1, Cout, M) if small_out else (1, TR, Wo, Np)
        x_rows = x_ref[0, 0]                                  # (rows_in, Wo, kw*Cin)

        # Patch tile: only kh wide-lane pieces (kw unroll was done in XLA).
        # K ordering: kh outer, kw middle, Cin inner == wrapper weight reshape.
        pieces = [x_rows[di:di + (TR - 1) * sh + 1:sh] for di in range(kh)]
        patches = jnp.concatenate(pieces, axis=-1) if kh > 1 else pieces[0]

        # TODO(synk): when Wo % 8 != 0 this reshape forces a relayout; switch
        # to a 3-D lax.dot_general contracting the last dim in that case.
        acc = jnp.dot(patches.reshape(M, K), w_ref[...],
                      preferred_element_type=jnp.float32)     # (M, Np) f32
        acc = acc + b_ref[...]

        if small_out:
            # Lane-dense (Cout, M) store: the transpose rides the XLU slot,
            # writeback shrinks Np/Cout x, wrapper transpose becomes a reshape.
            o_ref[0] = jnp.transpose(acc)[:Cout, :].astype(o_ref.dtype)
        else:
            o_ref[0] = acc.reshape(TR, Wo, Np).astype(o_ref.dtype)

    return kernel


@functools.partial(
    jax.jit,
    static_argnames=("kernel_size", "padding", "stride", "compute_dtype"))
def conv2d_pallas(x, weights_k, weights_b, *, kernel_size, padding, stride,
                  compute_dtype=jnp.bfloat16):
    """x: (B, Cin, H, W) NCHW.  Returns (B, Cout, Ho, Wo) NCHW, float32.

    compute_dtype=bfloat16 (default) halves MXU-input/DMA bytes; accumulation
    stays float32.  Pass float32 for strict-accuracy checks.
    """
    kh, kw = kernel_size
    ph, pw = padding
    sh, sw = stride
    B, Cin, H, W = x.shape
    Cout = weights_k.shape[0]

    Ho = (H + 2 * ph - kh) // sh + 1
    Wo = (W + 2 * pw - kw) // sw + 1
    Hp = H + 2 * ph

    LANE, SUB = 128, 8
    C2 = kw * Cin                      # lane width of the width-unrolled input
    K = kh * C2                        # GEMM contraction depth
    Np = pl.cdiv(Cout, LANE) * LANE    # lane-dense GEMM N

    # ---- row-tile / output-path selection -----------------------------------
    M_TARGET = 2048                    # GEMM rows per step (~1 MiB f32 acc)
    tr_cap = max(1, min(Ho, M_TARGET // Wo))
    small_out = (Cout < LANE) and (Wo % SUB == 0)
    if small_out:
        g = LANE // math.gcd(Wo, LANE)         # smallest TR with TR*Wo % 128 == 0
        TR = (tr_cap // g) * g
        small_out = TR > 0
    if not small_out:
        TR = (tr_cap - tr_cap % SUB) if tr_cap >= SUB else tr_cap
    n_tiles = pl.cdiv(Ho, TR)
    Ho_pad = n_tiles * TR              # ragged last tile handled via padding
    rows_in = (TR - 1) * sh + kh       # input rows (incl. halo) per row tile
    M = TR * Wo

    cd = compute_dtype

    # ---- cheap XLA-side glue (no full im2col materialization) ---------------
    # NCHW -> NHWC, spatial pad, cast.
    xp = jnp.pad(jnp.transpose(x, (0, 2, 3, 1)).astype(cd),
                 ((0, 0), (ph, ph), (pw, pw), (0, 0)))          # (B, Hp, Wp, Cin)
    # Width unroll (kw static slices, stride sw applied once in XLA).
    xw = jnp.concatenate(
        [xp[:, :, dj:dj + (Wo - 1) * sw + 1:sw, :] for dj in range(kw)],
        axis=-1)                                                # (B, Hp, Wo, kw*Cin)
    # Pad rows so every (overlapping) row-tile source window is in bounds.
    rows_need = (n_tiles - 1) * TR * sh + rows_in
    if rows_need > Hp:
        xw = jnp.pad(xw, ((0, 0), (0, rows_need - Hp), (0, 0), (0, 0)))
    # Row-halo pack: (B, n_tiles, rows_in, Wo, kw*Cin).  Per-step VMEM is now
    # bounded by rows_in rows instead of the full padded image.
    xt = jnp.stack(
        [xw[:, t * TR * sh:t * TR * sh + rows_in] for t in range(n_tiles)],
        axis=1)

    # Weights: (Cout, Cin, kh, kw) -> (kh, kw, Cin, Cout) -> (K, Cout), pad N.
    w_mat = jnp.transpose(weights_k, (2, 3, 1, 0)).reshape(K, Cout)
    w_mat = jnp.pad(w_mat.astype(cd), ((0, 0), (0, Np - Cout)))
    # Effective bias: module adds b[o, ci] per input channel then sums over ci.
    b_eff = weights_b.sum(axis=(1, 2)).astype(jnp.float32)
    b_eff = jnp.pad(b_eff, (0, Np - Cout)).reshape(1, Np)

    kernel = _make_conv_kernel(kh=kh, sh=sh, TR=TR, Wo=Wo, K=K, Np=Np,
                               Cout=Cout, small_out=small_out)

    if small_out:
        out_shape = jax.ShapeDtypeStruct((B, Cout, Ho_pad * Wo), jnp.float32)
        out_specs = pl.BlockSpec((1, Cout, M), lambda b, r: (b, 0, r))
        out_blk_bytes = Cout * M * 4
    else:
        out_shape = jax.ShapeDtypeStruct((B, Ho_pad, Wo, Np), jnp.float32)
        out_specs = pl.BlockSpec((1, TR, Wo, Np), lambda b, r: (b, r, 0, 0))
        out_blk_bytes = M * Np * 4

    # VMEM budget: double-buffered blocks + in-kernel temporaries, with slack.
    isz = jnp.dtype(cd).itemsize
    est = (2 * rows_in * Wo * C2 * isz          # x row-halo tile  (x2 buffers)
           + 2 * K * Np * isz + 2 * Np * 4      # weights + bias   (x2 buffers)
           + 2 * out_blk_bytes                  # output tile      (x2 buffers)
           + M * K * isz + 2 * M * Np * 4)      # patches + acc/transpose temps
    vmem_limit = int(min(64 * 2 ** 20, max(16 * 2 ** 20, 2 * est)))

    cost = pl.CostEstimate(
        flops=int(2 * B * Ho * Wo * K * Cout),
        transcendentals=0,
        bytes_accessed=int(xt.size * isz + w_mat.size * isz + b_eff.size * 4
                           + B * n_tiles * out_blk_bytes))

    out = pl.pallas_call(
        kernel,
        out_shape=out_shape,
        grid=(B, n_tiles),
        in_specs=[
            pl.BlockSpec((1, 1, rows_in, Wo, C2), lambda b, r: (b, r, 0, 0, 0)),
            pl.BlockSpec((K, Np), lambda b, r: (0, 0)),    # resident weights
            pl.BlockSpec((1, Np), lambda b, r: (0, 0)),    # resident bias
        ],
        out_specs=out_specs,
        compiler_params=pltpu.CompilerParams(
            dimension_semantics=("parallel", "parallel"),
            vmem_limit_bytes=vmem_limit),
        cost_estimate=cost,
    )(xt, w_mat, b_eff)

    if small_out:
        # Already channel-major: free reshape + slice off the Ho padding rows.
        return out.reshape(B, Cout, Ho_pad, Wo)[:, :, :Ho, :]
    # Lane-padded NHWC path (Cout >= 128): slice pad, transpose to NCHW.
    return jnp.transpose(out[:, :Ho, :, :Cout], (0, 3, 1, 2))


if __name__ == "__main__":
    # Module config: Conv2d(c_in=4, c_out=8, kernel_size=3, padding=1, stride=1)
    c_in, c_out = 4, 8
    kernel_size = (3, 3)
    padding = (1, 1)
    stride = (1, 1)

    key = jax.random.PRNGKey(0)
    k_x, k_w, k_b = jax.random.split(key, 3)

    x = jax.random.normal(k_x, (2, c_in, 16, 16), dtype=jnp.float32)
    weights_k = jax.random.normal(k_w, (c_out, c_in, *kernel_size),
                                  dtype=jnp.float32)            # ~ Normal(0, 1)
    # Nonzero bias so the effective-bias path is actually exercised
    # (module init is zeros, but the parameter is trainable).
    weights_b = 0.5 * jax.random.normal(k_b, (c_out, c_in, 1), dtype=jnp.float32)

    bias_eff = weights_b.sum(axis=(1, 2)).reshape(1, c_out, 1, 1)

    def ref_conv(xf, wf):
        return jax.lax.conv_general_dilated(
            xf, wf, window_strides=stride,
            padding=[(padding[0], padding[0]), (padding[1], padding[1])],
            dimension_numbers=("NCHW", "OIHW", "NCHW"),
            precision=jax.lax.Precision.HIGHEST) + bias_eff

    # 1) strict float32 check
    y32 = conv2d_pallas(x, weights_k, weights_b, kernel_size=kernel_size,
                        padding=padding, stride=stride,
                        compute_dtype=jnp.float32)
    y32 = jax.block_until_ready(y32)
    assert y32.shape == (2, c_out, 16, 16), y32.shape
    ref32 = ref_conv(x, weights_k)
    err32 = float(jnp.max(jnp.abs(y32 - ref32)))
    assert jnp.allclose(y32, ref32, atol=2e-4, rtol=2e-4), err32

    # 2) default bfloat16 compute (f32 accumulation) vs a bf16-cast reference
    y16 = conv2d_pallas(x, weights_k, weights_b, kernel_size=kernel_size,
                        padding=padding, stride=stride)
    y16 = jax.block_until_ready(y16)
    xb = x.astype(jnp.bfloat16).astype(jnp.float32)
    wb = weights_k.astype(jnp.bfloat16).astype(jnp.float32)
    ref16 = ref_conv(xb, wb)
    err16 = float(jnp.max(jnp.abs(y16 - ref16)))
    assert jnp.allclose(y16, ref16, atol=2e-2, rtol=2e-2), err16

    print("KERNEL_OK")
</pallas_src>

<mosaic_0001>
module attributes {stable_mosaic.version = 11 : i64} {
  func.func @kernel(%arg0: i32, %arg1: i32, %arg2: memref<1x1x18x16x12xf32, #tpu.memory_space<vmem>>, %arg3: memref<36x128xf32, #tpu.memory_space<vmem>>, %arg4: memref<1x128xf32, #tpu.memory_space<vmem>>, %arg5: memref<1x8x256xf32, #tpu.memory_space<vmem>>) attributes {dimension_semantics = [#tpu.dimension_semantics<parallel>, #tpu.dimension_semantics<parallel>], iteration_bounds = array<i64: 2, 1>, scalar_prefetch = 0 : i64, scratch_operands = 0 : i64, tpu.core_type = #tpu.core_type<tc>, window_params = [{transform_indices = @transform_0, window_bounds = array<i64: 1, 1, 18, 16, 12>}, {pipeline_mode = #tpu.pipeline_mode<synchronous>, transform_indices = @transform_1, window_bounds = array<i64: 36, 128>}, {pipeline_mode = #tpu.pipeline_mode<synchronous>, transform_indices = @transform_2, window_bounds = array<i64: 1, 128>}, {transform_indices = @transform_3, window_bounds = array<i64: 1, 8, 256>}]} {
    %c0 = arith.constant 0 : index
    %c0_0 = arith.constant 0 : index
    %c0_1 = arith.constant 0 : index
    %c0_2 = arith.constant 0 : index
    %c0_3 = arith.constant 0 : index
    %0 = vector.load %arg2[%c0, %c0_0, %c0_1, %c0_2, %c0_3] : memref<1x1x18x16x12xf32, #tpu.memory_space<vmem>>, vector<1x1x18x16x12xf32>
    %1 = vector.shape_cast %0 : vector<1x1x18x16x12xf32> to vector<18x16x12xf32>
    %2 = vector.extract_strided_slice %1 {offsets = [0, 0, 0], sizes = [16, 16, 12], strides = [1, 1, 1]} : vector<18x16x12xf32> to vector<16x16x12xf32>
    %3 = vector.extract_strided_slice %1 {offsets = [1, 0, 0], sizes = [16, 16, 12], strides = [1, 1, 1]} : vector<18x16x12xf32> to vector<16x16x12xf32>
    %4 = vector.extract_strided_slice %1 {offsets = [2, 0, 0], sizes = [16, 16, 12], strides = [1, 1, 1]} : vector<18x16x12xf32> to vector<16x16x12xf32>
    %5 = tpu.concatenate %2, %3, %4 in 2 : vector<16x16x12xf32>, vector<16x16x12xf32>, vector<16x16x12xf32> -> vector<16x16x36xf32>
    %6 = vector.shape_cast %5 : vector<16x16x36xf32> to vector<256x36xf32>
    %c0_4 = arith.constant 0 : index
    %c0_5 = arith.constant 0 : index
    %7 = vector.load %arg3[%c0_4, %c0_5] : memref<36x128xf32, #tpu.memory_space<vmem>>, vector<36x128xf32>
    %cst = arith.constant dense<0.000000e+00> : vector<256x128xf32>
    %8 = tpu.matmul %6, %7, %cst {dimension_numbers = #tpu.dot_dimension_numbers<[1], [0], [0], [1], [0, 0, 1, 1], [], []>} : vector<256x36xf32>, vector<36x128xf32>, vector<256x128xf32> -> vector<256x128xf32>
    %c0_6 = arith.constant 0 : index
    %c0_7 = arith.constant 0 : index
    %9 = vector.load %arg4[%c0_6, %c0_7] : memref<1x128xf32, #tpu.memory_space<vmem>>, vector<1x128xf32>
    %10 = vector.broadcast %9 : vector<1x128xf32> to vector<256x128xf32>
    %11 = arith.addf %8, %10 : vector<256x128xf32>
    %12 = tpu.transpose %11, [1, 0] : vector<256x128xf32> -> vector<128x256xf32>
    %13 = vector.extract_strided_slice %12 {offsets = [0, 0], sizes = [8, 256], strides = [1, 1]} : vector<128x256xf32> to vector<8x256xf32>
    %c0_8 = arith.constant 0 : index
    %c0_9 = arith.constant 0 : index
    %c0_10 = arith.constant 0 : index
    %14 = vector.load %arg5[%c0_8, %c0_9, %c0_10] : memref<1x8x256xf32, #tpu.memory_space<vmem>>, vector<1x8x256xf32>
    %15 = vector.shape_cast %14 : vector<1x8x256xf32> to vector<8x256xf32>
    %16 = vector.shape_cast %13 : vector<8x256xf32> to vector<1x8x256xf32>
    tpu.vector_store %arg5[%c0_8, %c0_9, %c0_10], %16 {strides = array<i32>} : memref<1x8x256xf32, #tpu.memory_space<vmem>>, vector<1x8x256xf32>,
    return
  }
  func.func @transform_0(%arg0: i32, %arg1: i32) -> (i32, i32, i32, i32, i32) {
    %c0_i32 = arith.constant 0 : i32
    %c0_i32_0 = arith.constant 0 : i32
    %c0_i32_1 = arith.constant 0 : i32
    %c0_i32_2 = arith.constant 0 : i32
    return %arg0, %arg1, %c0_i32, %c0_i32_0, %c0_i32_1 : i32, i32, i32, i32, i32
  }
  func.func @transform_1(%arg0: i32, %arg1: i32) -> (i32, i32) {
    %c0_i32 = arith.constant 0 : i32
    %c0_i32_0 = arith.constant 0 : i32
    %c0_i32_1 = arith.constant 0 : i32
    return %c0_i32, %c0_i32_0 : i32, i32
  }
  func.func @transform_2(%arg0: i32, %arg1: i32) -> (i32, i32) {
    %c0_i32 = arith.constant 0 : i32
    %c0_i32_0 = arith.constant 0 : i32
    %c0_i32_1 = arith.constant 0 : i32
    return %c0_i32, %c0_i32_0 : i32, i32
  }
  func.func @transform_3(%arg0: i32, %arg1: i32) -> (i32, i32, i32) {
    %c0_i32 = arith.constant 0 : i32
    %c0_i32_0 = arith.constant 0 : i32
    return %arg0, %c0_i32, %arg1 : i32, i32, i32
  }
}

</mosaic_0001>

<bundles_post_ra>
// kernel: conv2d_pallas.1
= control target key start
LH: loop header
LB: loop body
LE: loop exit
PB: predicated region body
PF: predicated region fallthrough
CT: control target
= control target key end

     0   :  { %s1257_s12 = smov 0   ;;  %s1259_s13 = smov 0   ;;  %s1682_s0 = inlined_call_operand.vmem [shape: f32[2,1,18,16,12], index: 0, kind: input, shape index: {}]   ;;  %s1683_s1 = inlined_call_operand.vmem [shape: f32[36,128], index: 1, kind: input, shape index: {}]   ;;  %s1684_s2 = inlined_call_operand.vmem [shape: f32[1,128], index: 2, kind: input, shape index: {}]   ;;  %s1685_s3 = inlined_call_operand.vmem [shape: f32[2,8,256], index: 3, kind: output, shape index: {}]  }
   0x1   :  { %s1261_s14 = smov 0  }
   0x2 LB: > { %s25_s15 = sadd.s32 1, %s1229_s13  ;;  %p1034_p0 = scmp.ge.s32.totalorder %s1233_s14, 1  ;;  %s1233_s14 = sphi %s1261_s14, %s13_s14   ;;  %s1229_s13 = sphi %s1259_s13, %s1687_s13   ;;  %s1225_s12 = sphi %s1257_s12, %s1686_s12  }
   0x3   : > { %p27_p1 = scmp.ge.s32.totalorder %s25_s15, 2  ;;  %p157_p2 = scmp.lt.s32.totalorder %s1233_s14, 3 }
   0x5   : > { %s1689_s15 = smov (%p27_p1, %s25_s15), 0  ;;  %p158_p3 = pnand %p1034_p0, %p157_p2 }
   0x6   : > { %p189_p4 = scmp.lt.s32.totalorder (!%p158_p3), %s1225_s12, 1  ;;  %v536_v0 = vld [vmem:[%s1683_s1] sm:$0xff] (!%p158_p3)  ;;  %v537_v1 = vld [vmem:[%s1683_s1 + $0x8] sm:$0xff] (!%p158_p3)  ;;  %v538_v2 = vld [vmem:[%s1683_s1 + $0x10] sm:$0xff] (!%p158_p3)  ;;  %vm645_vm0 = vcmask (!%p158_p3), 1043456   ;;  %s1235_s30 = smov (!%p158_p3), 12  }
   0x7   : > { %161 = sbr.rel (%p158_p3) target bundleno = 548 (0x224), region = 32  ;;  %v1170_v3 = vpack.c.bf16 (!%p158_p3), %v537_v1, %v536_v0  ;;  %v539_v4 = vld [vmem:[%s1683_s1 + $0x18] sm:$0xff] (!%p158_p3)  ;;  %v540_v8 = vld [vmem:[%s1683_s1 + $0x20] sm:$0xf] (!%p158_p3)  ;;  %s1236_s4 = smov (!%p158_p3), 24   ;;  %vm470_vm1 = vcmask (!%p158_p3), 97280  }
   0x8   : > { %v1174_v5 = vpack.c.bf16 (!%p158_p3), %v539_v4, %v538_v2  ;;  %vm503_vm2 = vcmask (!%p158_p3), 195584   ;;  %vm548_vm3 = vcmask (!%p158_p3), 293888  }
   0x9   : > { %1171 = vmatprep.subr.bf16.mxu0 (!%p158_p3), %v1170_v3  ;;  %1178 = vmatprep.subr.bf16.mxu1 (!%p158_p3), %v1170_v3 }
   0xa   : > { %1173 = vmatpush3.bf16.msra.mxu0 (!%p158_p3), %v1170_v3  ;;  %1181 = vmatpush3.bf16.msra.mxu1 (!%p158_p3), %v1170_v3 }
   0xb   : > { %1175 = vmatprep.subr.bf16.mxu0 (!%p158_p3), %v1174_v5  ;;  %1179 = vmatprep.subr.bf16.mxu1 (!%p158_p3), %v1174_v5 }
   0xe   : > { %s1691_s12 = smov (!%p189_p4, %s1225_s12), 1  ;;  %1177 = vmatpush3.bf16.msra.mxu0 %v1174_v5  ;;  %1182 = vmatpush3.bf16.msra.mxu1 %v1174_v5 }
   0xf   : > { %s1184_s24 = smul.u32 288, %s1691_s12  ;;  %1120 = vmatprep.subr.msk.mxu0 %vm645_vm0, %v540_v8  ;;  %1180 = vmatprep.subr.msk.mxu1 %vm645_vm0, %v540_v8  ;;  %s1074_s7 = sshll.u32 %s1691_s12, 4 }
  0x10   : > { %s206_s10 = scalar_lea.vmem %s1685_s3, %s1074_s7 }
  0x11   : > { %s1293_s27 = scalar_lea.vmem %s1682_s0, %s1184_s24 }
  0x12   : > { %v1296_v6 = vld [vmem:[%s1293_s27 + $0x18] sm:$0xff]  ;;  %v1299_v7 = vld [vmem:[%s1293_s27 + $0x10] sm:$0xff]  ;;  %v1319_v11 = vld [vmem:[%s1293_s27 + $0xa0] sm:$0xff]  ;;  %1121 = vmatpush3.msk.msra.mxu0 %vm645_vm0, %v540_v8  ;;  %1183 = vmatpush3.msk.msra.mxu1 %vm645_vm0, %v540_v8 }
  0x13   : > { %278 = vrot.lane.b32.xlu1 %v1296_v6, %s1235_s30  ;;  %276 = vrot.lane.b32.xlu0 %v1299_v7, %s1235_s30  ;;  %v1309_v9 = vld [vmem:[%s1293_s27 + $0x98] sm:$0xff]  ;;  %v1312_v10 = vld [vmem:[%s1293_s27 + $0x90] sm:$0xff] }
  0x14   : > { %v1322_v12 = vld [vmem:[%s1293_s27 + $0x20] sm:$0xff]  ;;  %v1329_v13 = vld [vmem:[%s1293_s27 + $0xa8] sm:$0xff]  ;;  %v1347_v15 = vld [vmem:[%s1293_s27 + $0xb0] sm:$0xff] }
  0x15   : > { %v1332_v14 = vld [vmem:[%s1293_s27 + $0x28] sm:$0xff]  ;;  %v1350_v16 = vld [vmem:[%s1293_s27 + $0x30] sm:$0xff]  ;;  %v1357_v17 = vld [vmem:[%s1293_s27 + $0xb8] sm:$0xff] }
  0x16   : > { %v1360_v18 = vld [vmem:[%s1293_s27 + $0x38] sm:$0xff]  ;;  %v1375_v19 = vld [vmem:[%s1293_s27 + $0xc0] sm:$0xff]  ;;  %v1385_v21 = vld [vmem:[%s1293_s27 + $0xc8] sm:$0xff] }
  0x17   : > { %310 = vrot.lane.b32.xlu1 %v1309_v9, %s1235_s30  ;;  %308 = vrot.lane.b32.xlu0 %v1312_v10, %s1235_s30  ;;  %v1378_v20 = vld [vmem:[%s1293_s27 + $0x40] sm:$0xff]  ;;  %v1388_v22 = vld [vmem:[%s1293_s27 + $0x48] sm:$0xff] }
  0x18   : > { %v1403_v23 = vld [vmem:[%s1293_s27 + $0xd0] sm:$0xff]  ;;  %v1413_v25 = vld [vmem:[%s1293_s27 + $0xd8] sm:$0xff]  ;;  %v1431_v27 = vld [vmem:[%s1293_s27 + $0xe0] sm:$0xff] }
  0x19   : > { %v1406_v24 = vld [vmem:[%s1293_s27 + $0x50] sm:$0xff]  ;;  %v1416_v26 = vld [vmem:[%s1293_s27 + $0x58] sm:$0xff]  ;;  %v1434_v28 = vld [vmem:[%s1293_s27 + $0x60] sm:$0xff] }
  0x1a   : > { %v1441_v29 = vld [vmem:[%s1293_s27 + $0xe8] sm:$0xff]  ;;  %v1459_v31 = vld [vmem:[%s1293_s27 + $0xf0] sm:$0xff]  ;;  %v1469_v33 = vld [vmem:[%s1293_s27 + $0xf8] sm:$0xff] }
  0x1b   : > { %406 = vrot.lane.b32.xlu1 %v1319_v11, %s1236_s4  ;;  %374 = vrot.lane.b32.xlu0 %v1322_v12, %s1236_s4  ;;  %v1444_v30 = vld [vmem:[%s1293_s27 + $0x68] sm:$0xff]  ;;  %v1462_v32 = vld [vmem:[%s1293_s27 + $0x70] sm:$0xff] }
  0x1c   : > { %v1472_v34 = vld [vmem:[%s1293_s27 + $0x78] sm:$0xff]  ;;  %v240_v35 = vld [vmem:[%s1293_s27 + $0x100] sm:$0xff]  ;;  %v241_v37 = vld [vmem:[%s1293_s27 + $0x108] sm:$0xff] }
  0x1d   : > { %v224_v36 = vld [vmem:[%s1293_s27 + $0x80] sm:$0xff]  ;;  %v225_v38 = vld [vmem:[%s1293_s27 + $0x88] sm:$0xff]  ;;  %v242_v41 = vld [vmem:[%s1293_s27 + $0x110] sm:$0xff] }
  0x1e   : > { %v208_v44 = vld [vmem:[%s1293_s27] sm:$0xff]  ;;  %v243_v45 = vld [vmem:[%s1293_s27 + $0x118] sm:$0xff]  ;;  %v209_v50 = vld [vmem:[%s1293_s27 + $0x8] sm:$0xff] }
  0x1f   : > { %408 = vrot.lane.b32.xlu1 %v1329_v13, %s1236_s4  ;;  %376 = vrot.lane.b32.xlu0 %v1332_v14, %s1236_s4 }
  0x23   : > { %312 = vrot.lane.b32.xlu1 %v1319_v11, %s1235_s30  ;;  %280 = vrot.lane.b32.xlu0 %v1322_v12, %s1235_s30 }
  0x27   : > { %314 = vrot.lane.b32.xlu1 %v1329_v13, %s1235_s30  ;;  %282 = vrot.lane.b32.xlu0 %v1332_v14, %s1235_s30 }
  0x2b   : > { %410 = vrot.lane.b32.xlu1 %v1347_v15, %s1236_s4  ;;  %378 = vrot.lane.b32.xlu0 %v1350_v16, %s1236_s4 }
  0x2f   : > { %412 = vrot.lane.b32.xlu1 %v1357_v17, %s1236_s4  ;;  %380 = vrot.lane.b32.xlu0 %v1360_v18, %s1236_s4 }
  0x33   : > { %316 = vrot.lane.b32.xlu1 %v1347_v15, %s1235_s30  ;;  %284 = vrot.lane.b32.xlu0 %v1350_v16, %s1235_s30 }
  0x37   : > { %318 = vrot.lane.b32.xlu1 %v1357_v17, %s1235_s30  ;;  %286 = vrot.lane.b32.xlu0 %v1360_v18, %s1235_s30 }
  0x3b   : > { %414 = vrot.lane.b32.xlu1 %v1375_v19, %s1236_s4  ;;  %382 = vrot.lane.b32.xlu0 %v1378_v20, %s1236_s4 }
  0x3f   : > { %416 = vrot.lane.b32.xlu1 %v1385_v21, %s1236_s4  ;;  %384 = vrot.lane.b32.xlu0 %v1388_v22, %s1236_s4 }
  0x43   : > { %320 = vrot.lane.b32.xlu1 %v1375_v19, %s1235_s30  ;;  %288 = vrot.lane.b32.xlu0 %v1378_v20, %s1235_s30 }
  0x47   : > { %322 = vrot.lane.b32.xlu1 %v1385_v21, %s1235_s30  ;;  %290 = vrot.lane.b32.xlu0 %v1388_v22, %s1235_s30 }
  0x4b   : > { %418 = vrot.lane.b32.xlu1 %v1403_v23, %s1236_s4  ;;  %386 = vrot.lane.b32.xlu0 %v1406_v24, %s1236_s4 }
  0x4f   : > { %420 = vrot.lane.b32.xlu1 %v1413_v25, %s1236_s4  ;;  %388 = vrot.lane.b32.xlu0 %v1416_v26, %s1236_s4 }
  0x53   : > { %324 = vrot.lane.b32.xlu1 %v1403_v23, %s1235_s30  ;;  %292 = vrot.lane.b32.xlu0 %v1406_v24, %s1235_s30 }
  0x57   : > { %326 = vrot.lane.b32.xlu1 %v1413_v25, %s1235_s30  ;;  %294 = vrot.lane.b32.xlu0 %v1416_v26, %s1235_s30 }
  0x5b   : > { %422 = vrot.lane.b32.xlu1 %v1431_v27, %s1236_s4  ;;  %390 = vrot.lane.b32.xlu0 %v1434_v28, %s1236_s4 }
  0x5f   : > { %424 = vrot.lane.b32.xlu1 %v1441_v29, %s1236_s4  ;;  %392 = vrot.lane.b32.xlu0 %v1444_v30, %s1236_s4 }
  0x63   : > { %328 = vrot.lane.b32.xlu1 %v1431_v27, %s1235_s30  ;;  %296 = vrot.lane.b32.xlu0 %v1434_v28, %s1235_s30 }
  0x67   : > { %330 = vrot.lane.b32.xlu1 %v1441_v29, %s1235_s30  ;;  %298 = vrot.lane.b32.xlu0 %v1444_v30, %s1235_s30 }
  0x6b   : > { %426 = vrot.lane.b32.xlu1 %v1459_v31, %s1236_s4  ;;  %394 = vrot.lane.b32.xlu0 %v1462_v32, %s1236_s4 }
  0x6f   : > { %428 = vrot.lane.b32.xlu1 %v1469_v33, %s1236_s4  ;;  %396 = vrot.lane.b32.xlu0 %v1472_v34, %s1236_s4 }
  0x73   : > { %332 = vrot.lane.b32.xlu1 %v1459_v31, %s1235_s30  ;;  %300 = vrot.lane.b32.xlu0 %v1462_v32, %s1235_s30 }
  0x77   : > { %334 = vrot.lane.b32.xlu1 %v1469_v33, %s1235_s30  ;;  %302 = vrot.lane.b32.xlu0 %v1472_v34, %s1235_s30 }
  0x7b   : > { %430 = vrot.lane.b32.xlu1 %v240_v35, %s1236_s4  ;;  %398 = vrot.lane.b32.xlu0 %v224_v36, %s1236_s4 }
  0x7f   : > { %432 = vrot.lane.b32.xlu1 %v241_v37, %s1236_s4  ;;  %400 = vrot.lane.b32.xlu0 %v225_v38, %s1236_s4 }
  0x83   : > { %336 = vrot.lane.b32.xlu1 %v240_v35, %s1235_s30  ;;  %304 = vrot.lane.b32.xlu0 %v224_v36, %s1235_s30 }
  0x85   : > { %v279_v39 = vpop.permute.xlu1 %278  ;;  %v277_v40 = vpop.permute.xlu0 %276 }
  0x86   : > { %v471_v46 = vsel %vm470_vm1, %v208_v44, %v277_v40  ;;  %v472_v53 = vsel %vm470_vm1, %v209_v50, %v279_v39 }
  0x87   : > { %338 = vrot.lane.b32.xlu1 %v241_v37, %s1235_s30  ;;  %306 = vrot.lane.b32.xlu0 %v225_v38, %s1235_s30 }
  0x89   : > { %v311_v42 = vpop.permute.xlu1 %310  ;;  %v309_v43 = vpop.permute.xlu0 %308 }
  0x8a   : > { %v487_v47 = vsel %vm470_vm1, %v224_v36, %v309_v43  ;;  %v488_v54 = vsel %vm470_vm1, %v225_v38, %v311_v42 }
  0x8b   : > { %434 = vrot.lane.b32.xlu1 %v242_v41, %s1236_s4  ;;  %402 = vrot.lane.b32.xlu0 %v1312_v10, %s1236_s4 }
  0x8d   : > { %v407_v48 = vpop.permute.xlu1 %406  ;;  %v375_v49 = vpop.permute.xlu0 %374 }
  0x8e   : > { %v504_v51 = vsel %vm503_vm2, %v471_v46, %v375_v49  ;;  %v520_v52 = vsel %vm503_vm2, %v487_v47, %v407_v48 }
  0x8f   : > { %436 = vrot.lane.b32.xlu1 %v243_v45, %s1236_s4  ;;  %404 = vrot.lane.b32.xlu0 %v1309_v9, %s1236_s4 }
  0x90   : > { %1122 = vmatprep.mubr.msk.f32.mxu0 %vm548_vm3, %v504_v51  ;;  %1146 = vmatprep.mubr.msk.f32.mxu1 %vm548_vm3, %v520_v52 }
  0x91   : > { %v409_v55 = vpop.permute.xlu1 %408  ;;  %v377_v56 = vpop.permute.xlu0 %376 }
  0x92   : > { %v521_v57 = vsel %vm503_vm2, %v488_v54, %v409_v55  ;;  %v505_v58 = vsel %vm503_vm2, %v472_v53, %v377_v56 }
  0x93   : > { %1123 = vmatmul.mubr.msk.f32.vlgmr.msra.gmra.mrb[0].mxu0 %vm548_vm3, %v505_v58  ;;  %1147 = vmatmul.mubr.msk.f32.vlgmr.msra.gmra.mrb[0].mxu1 %vm548_vm3, %v521_v57 }
  0x95   : > { %v313_v59 = vpop.permute.xlu1 %312  ;;  %v281_v60 = vpop.permute.xlu0 %280 }
  0x96   : > { %v489_v63 = vsel %vm470_vm1, %v1312_v10, %v313_v59  ;;  %v473_v0 = vsel %vm470_vm1, %v1299_v7, %v281_v60 }
  0x99   : > { %v315_v61 = vpop.permute.xlu1 %314  ;;  %v283_v62 = vpop.permute.xlu0 %282 }
  0x9a   : > { %v490_v5 = vsel %vm470_vm1, %v1309_v9, %v315_v61  ;;  %v474_v8 = vsel %vm470_vm1, %v1296_v6, %v283_v62 }
  0x9d   : > { %v411_v1 = vpop.permute.xlu1 %410  ;;  %v379_v2 = vpop.permute.xlu0 %378 }
  0x9e   : > { %v522_v3 = vsel %vm503_vm2, %v489_v63, %v411_v1  ;;  %v506_v4 = vsel %vm503_vm2, %v473_v0, %v379_v2 }
  0x9f   : > { %1125 = vmatprep.mubr.msk.f32.mxu0 %vm548_vm3, %v506_v4  ;;  %1149 = vmatprep.mubr.msk.f32.mxu1 %vm548_vm3, %v522_v3 }
  0xa1   : > { %v413_v10 = vpop.permute.xlu1 %412  ;;  %v381_v35 = vpop.permute.xlu0 %380 }
  0xa2   : > { %v523_v7 = vsel %vm503_vm2, %v490_v5, %v413_v10  ;;  %v507_v36 = vsel %vm503_vm2, %v474_v8, %v381_v35 }
  0xa3   : > { %1126 = vmatmul.mubr.msk.f32.gmra.mrb[2].mxu0 %vm548_vm3, %v507_v36  ;;  %1150 = vmatmul.mubr.msk.f32.gmra.mrb[2].mxu1 %vm548_vm3, %v523_v7 }
  0xa5   : > { %v317_v37 = vpop.permute.xlu1 %316  ;;  %v285_v38 = vpop.permute.xlu0 %284 }
  0xa6   : > { %v491_v9 = vsel %vm470_vm1, %v1319_v11, %v317_v37  ;;  %v475_v6 = vsel %vm470_vm1, %v1322_v12, %v285_v38 }
  0xa9   : > { %v319_v39 = vpop.permute.xlu1 %318  ;;  %v287_v40 = vpop.permute.xlu0 %286 }
  0xaa   : > { %v492_v45 = vsel %vm470_vm1, %v1329_v13, %v319_v39  ;;  %v476_v46 = vsel %vm470_vm1, %v1332_v14, %v287_v40 }
  0xad   : > { %v415_v41 = vpop.permute.xlu1 %414  ;;  %v383_v42 = vpop.permute.xlu0 %382 }
  0xae   : > { %v524_v43 = vsel %vm503_vm2, %v491_v9, %v415_v41  ;;  %v508_v44 = vsel %vm503_vm2, %v475_v6, %v383_v42 }
  0xaf   : > { %1128 = vmatprep.mubr.msk.f32.mxu0 %vm548_vm3, %v508_v44  ;;  %1152 = vmatprep.mubr.msk.f32.mxu1 %vm548_vm3, %v524_v43 }
  0xb1   : > { %v417_v11 = vpop.permute.xlu1 %416  ;;  %v385_v47 = vpop.permute.xlu0 %384 }
  0xb2   : > { %v525_v12 = vsel %vm503_vm2, %v492_v45, %v417_v11  ;;  %v509_v48 = vsel %vm503_vm2, %v476_v46, %v385_v47 }
  0xb3   : > { %1129 = vmatmul.mubr.msk.f32.gmra.mrb[4].mxu0 %vm548_vm3, %v509_v48  ;;  %1153 = vmatmul.mubr.msk.f32.gmra.mrb[4].mxu1 %vm548_vm3, %v525_v12 }
  0xb5   : > { %v321_v49 = vpop.permute.xlu1 %320  ;;  %v289_v50 = vpop.permute.xlu0 %288 }
  0xb6   : > { %v493_v13 = vsel %vm470_vm1, %v1347_v15, %v321_v49  ;;  %v477_v14 = vsel %vm470_vm1, %v1350_v16, %v289_v50 }
  0xb9   : > { %v323_v51 = vpop.permute.xlu1 %322  ;;  %v291_v52 = vpop.permute.xlu0 %290 }
  0xba   : > { %v494_v57 = vsel %vm470_vm1, %v1357_v17, %v323_v51  ;;  %v478_v58 = vsel %vm470_vm1, %v1360_v18, %v291_v52 }
  0xbd   : > { %v419_v53 = vpop.permute.xlu1 %418  ;;  %v387_v54 = vpop.permute.xlu0 %386 }
  0xbe   : > { %v526_v55 = vsel %vm503_vm2, %v493_v13, %v419_v53  ;;  %v510_v56 = vsel %vm503_vm2, %v477_v14, %v387_v54 }
  0xbf   : > { %1131 = vmatprep.mubr.msk.f32.mxu0 %vm548_vm3, %v510_v56  ;;  %1155 = vmatprep.mubr.msk.f32.mxu1 %vm548_vm3, %v526_v55 }
  0xc1   : > { %v421_v15 = vpop.permute.xlu1 %420  ;;  %v389_v59 = vpop.permute.xlu0 %388 }
  0xc2   : > { %v527_v16 = vsel %vm503_vm2, %v494_v57, %v421_v15  ;;  %v511_v60 = vsel %vm503_vm2, %v478_v58, %v389_v59 }
  0xc3   : > { %1132 = vmatmul.mubr.msk.f32.gmra.mrb[6].mxu0 %vm548_vm3, %v511_v60  ;;  %1156 = vmatmul.mubr.msk.f32.gmra.mrb[6].mxu1 %vm548_vm3, %v527_v16 }
  0xc5   : > { %v325_v61 = vpop.permute.xlu1 %324  ;;  %v293_v62 = vpop.permute.xlu0 %292 }
  0xc6   : > { %v495_v17 = vsel %vm470_vm1, %v1375_v19, %v325_v61  ;;  %v479_v18 = vsel %vm470_vm1, %v1378_v20, %v293_v62 }
  0xc9   : > { %v327_v63 = vpop.permute.xlu1 %326  ;;  %v295_v0 = vpop.permute.xlu0 %294 }
  0xca   : > { %v496_v5 = vsel %vm470_vm1, %v1385_v21, %v327_v63  ;;  %v480_v8 = vsel %vm470_vm1, %v1388_v22, %v295_v0  ;;  %v1635_v63 = vld [vmem:[%s1684_s2] ss:$0 sm:$0xff] }
  0xcd   : > { %v423_v1 = vpop.permute.xlu1 %422  ;;  %v391_v2 = vpop.permute.xlu0 %390 }
  0xce   : > { %v528_v3 = vsel %vm503_vm2, %v495_v17, %v423_v1  ;;  %v512_v4 = vsel %vm503_vm2, %v479_v18, %v391_v2 }
  0xcf   : > { %1134 = vmatprep.mubr.msk.f32.mxu0 %vm548_vm3, %v512_v4  ;;  %1158 = vmatprep.mubr.msk.f32.mxu1 %vm548_vm3, %v528_v3 }
  0xd1   : > { %v425_v19 = vpop.permute.xlu1 %424  ;;  %v393_v10 = vpop.permute.xlu0 %392 }
  0xd2   : > { %v529_v20 = vsel %vm503_vm2, %v496_v5, %v425_v19  ;;  %v513_v35 = vsel %vm503_vm2, %v480_v8, %v393_v10 }
  0xd3   : > { %1135 = vmatmul.mubr.msk.f32.gmra.mrb[8].mxu0 %vm548_vm3, %v513_v35  ;;  %1159 = vmatmul.mubr.msk.f32.gmra.mrb[8].mxu1 %vm548_vm3, %v529_v20 }
  0xd5   : > { %v329_v7 = vpop.permute.xlu1 %328  ;;  %v297_v36 = vpop.permute.xlu0 %296 }
  0xd6   : > { %v497_v21 = vsel %vm470_vm1, %v1403_v23, %v329_v7  ;;  %v481_v22 = vsel %vm470_vm1, %v1406_v24, %v297_v36 }
  0xd9   : > { %v331_v37 = vpop.permute.xlu1 %330  ;;  %v299_v38 = vpop.permute.xlu0 %298 }
  0xda   : > { %v498_v41 = vsel %vm470_vm1, %v1413_v25, %v331_v37  ;;  %v482_v42 = vsel %vm470_vm1, %v1416_v26, %v299_v38 }
  0xdd   : > { %v427_v39 = vpop.permute.xlu1 %426  ;;  %v395_v40 = vpop.permute.xlu0 %394 }
  0xde   : > { %v530_v9 = vsel %vm503_vm2, %v497_v21, %v427_v39  ;;  %v514_v6 = vsel %vm503_vm2, %v481_v22, %v395_v40 }
  0xdf   : > { %1137 = vmatprep.mubr.msk.f32.mxu0 %vm548_vm3, %v514_v6  ;;  %1161 = vmatprep.mubr.msk.f32.mxu1 %vm548_vm3, %v530_v9 }
  0xe1   : > { %v429_v23 = vpop.permute.xlu1 %428  ;;  %v397_v43 = vpop.permute.xlu0 %396 }
  0xe2   : > { %v531_v24 = vsel %vm503_vm2, %v498_v41, %v429_v23  ;;  %v515_v44 = vsel %vm503_vm2, %v482_v42, %v397_v43 }
  0xe3   : > { %1138 = vmatmul.mubr.msk.f32.gmra.mrb[10].mxu0 %vm548_vm3, %v515_v44  ;;  %1162 = vmatmul.mubr.msk.f32.gmra.mrb[10].mxu1 %vm548_vm3, %v531_v24 }
  0xe5   : > { %v333_v45 = vpop.permute.xlu1 %332  ;;  %v301_v46 = vpop.permute.xlu0 %300 }
  0xe6   : > { %v499_v25 = vsel %vm470_vm1, %v1431_v27, %v333_v45  ;;  %v483_v26 = vsel %vm470_vm1, %v1434_v28, %v301_v46 }
  0xe9   : > { %v335_v11 = vpop.permute.xlu1 %334  ;;  %v303_v47 = vpop.permute.xlu0 %302 }
  0xea   : > { %v500_v51 = vsel %vm470_vm1, %v1441_v29, %v335_v11  ;;  %v484_v52 = vsel %vm470_vm1, %v1444_v30, %v303_v47 }
  0xed   : > { %v431_v12 = vpop.permute.xlu1 %430  ;;  %v399_v48 = vpop.permute.xlu0 %398 }
  0xee   : > { %v532_v49 = vsel %vm503_vm2, %v499_v25, %v431_v12  ;;  %v516_v50 = vsel %vm503_vm2, %v483_v26, %v399_v48 }
  0xef   : > { %1140 = vmatprep.mubr.msk.f32.mxu0 %vm548_vm3, %v516_v50  ;;  %1164 = vmatprep.mubr.msk.f32.mxu1 %vm548_vm3, %v532_v49 }
  0xf1   : > { %v433_v27 = vpop.permute.xlu1 %432  ;;  %v401_v13 = vpop.permute.xlu0 %400 }
  0xf2   : > { %v533_v28 = vsel %vm503_vm2, %v500_v51, %v433_v27  ;;  %v517_v14 = vsel %vm503_vm2, %v484_v52, %v401_v13 }
  0xf3   : > { %1141 = vmatmul.mubr.msk.f32.gmra.mrb[12].mxu0 %vm548_vm3, %v517_v14  ;;  %1165 = vmatmul.mubr.msk.f32.gmra.mrb[12].mxu1 %vm548_vm3, %v533_v28 }
  0xf5   : > { %v337_v53 = vpop.permute.xlu1 %336  ;;  %v305_v54 = vpop.permute.xlu0 %304 }
  0xf6   : > { %v501_v29 = vsel %vm470_vm1, %v1459_v31, %v337_v53  ;;  %v485_v30 = vsel %vm470_vm1, %v1462_v32, %v305_v54 }
  0xf9   : > { %v339_v55 = vpop.permute.xlu1 %338  ;;  %v307_v56 = vpop.permute.xlu0 %306 }
  0xfa   : > { %v502_v16 = vsel %vm470_vm1, %v1469_v33, %v339_v55  ;;  %v486_v60 = vsel %vm470_vm1, %v1472_v34, %v307_v56 }
  0xfd   : > { %v435_v57 = vpop.permute.xlu1 %434  ;;  %v403_v58 = vpop.permute.xlu0 %402 }
  0xfe   : > { %v534_v15 = vsel %vm503_vm2, %v501_v29, %v435_v57  ;;  %v518_v59 = vsel %vm503_vm2, %v485_v30, %v403_v58 }
  0xff   : > { %1143 = vmatprep.mubr.msk.f32.mxu0 %vm548_vm3, %v518_v59  ;;  %1167 = vmatprep.mubr.msk.f32.mxu1 %vm548_vm3, %v534_v15 }
 0x101   : > { %v437_v31 = vpop.permute.xlu1 %436  ;;  %v405_v61 = vpop.permute.xlu0 %404 }
 0x102   : > { %v535_v32 = vsel %vm503_vm2, %v502_v16, %v437_v31  ;;  %v519_v62 = vsel %vm503_vm2, %v486_v60, %v405_v61 }
 0x103   : > { %1144 = vmatmul.mubr.msk.f32.gmra.mrb[14].mxu0 %vm548_vm3, %v519_v62  ;;  %1168 = vmatmul.mubr.msk.f32.gmra.mrb[14].mxu1 %vm548_vm3, %v535_v32 }
 0x166   : > { %v1124_v0 = vpop.f32.mrb[0].mxu0  ;;  %v1148_v33 = vpop.f32.mrb[0].mxu1 }
 0x167   : > { %v715_v17 = vpop.f32.mrb[1].mxu0  ;;  %v795_v18 = vpop.f32.mrb[1].mxu1  ;;  %v721_v2 = vadd.f32 %v1124_v0, %v1635_v63  ;;  %v801_v3 = vadd.f32 %v1148_v33, %v1635_v63 }
 0x168   : > { %v716_v34 = vadd.f32 %v1635_v63, %v715_v17  ;;  %v796_v1 = vadd.f32 %v1635_v63, %v795_v18 }
 0x16a   : > { %906 = vxpose.xlu1.b32.start [1/16] (narrow) %v796_v1, 8  ;;  %874 = vxpose.xlu0.b32.start [1/16] (narrow) %v716_v34, 8 }
 0x16e   : > { %907 = vxpose.xlu1.b32.cont [2/16] (narrow) %v801_v3, 8  ;;  %875 = vxpose.xlu0.b32.cont [2/16] (narrow) %v721_v2, 8 }
 0x176   : > { %v1127_v4 = vpop.f32.mrb[2].mxu0  ;;  %v1151_v5 = vpop.f32.mrb[2].mxu1 }
 0x177   : > { %v725_v8 = vpop.f32.mrb[3].mxu0  ;;  %v805_v19 = vpop.f32.mrb[3].mxu1  ;;  %v731_v35 = vadd.f32 %v1127_v4, %v1635_v63  ;;  %v811_v7 = vadd.f32 %v1151_v5, %v1635_v63 }
 0x178   : > { %v726_v10 = vadd.f32 %v1635_v63, %v725_v8  ;;  %v806_v20 = vadd.f32 %v1635_v63, %v805_v19 }
 0x17a   : > { %908 = vxpose.xlu1.b32.cont [3/16] (narrow) %v806_v20, 8  ;;  %876 = vxpose.xlu0.b32.cont [3/16] (narrow) %v726_v10, 8 }
 0x17e   : > { %909 = vxpose.xlu1.b32.cont [4/16] (narrow) %v811_v7, 8  ;;  %877 = vxpose.xlu0.b32.cont [4/16] (narrow) %v731_v35, 8 }
 0x186   : > { %v1130_v36 = vpop.f32.mrb[4].mxu0  ;;  %v1154_v37 = vpop.f32.mrb[4].mxu1 }
 0x187   : > { %v735_v38 = vpop.f32.mrb[5].mxu0  ;;  %v815_v21 = vpop.f32.mrb[5].mxu1  ;;  %v741_v40 = vadd.f32 %v1130_v36, %v1635_v63  ;;  %v821_v9 = vadd.f32 %v1154_v37, %v1635_v63 }
 0x188   : > { %v736_v22 = vadd.f32 %v1635_v63, %v735_v38  ;;  %v816_v39 = vadd.f32 %v1635_v63, %v815_v21 }
 0x18a   : > { %910 = vxpose.xlu1.b32.cont [5/16] (narrow) %v816_v39, 8  ;;  %878 = vxpose.xlu0.b32.cont [5/16] (narrow) %v736_v22, 8 }
 0x18e   : > { %911 = vxpose.xlu1.b32.cont [6/16] (narrow) %v821_v9, 8  ;;  %879 = vxpose.xlu0.b32.cont [6/16] (narrow) %v741_v40, 8 }
 0x196   : > { %v1133_v6 = vpop.f32.mrb[6].mxu0  ;;  %v1157_v41 = vpop.f32.mrb[6].mxu1 }
 0x197   : > { %v745_v42 = vpop.f32.mrb[7].mxu0  ;;  %v825_v23 = vpop.f32.mrb[7].mxu1  ;;  %v751_v44 = vadd.f32 %v1133_v6, %v1635_v63  ;;  %v831_v45 = vadd.f32 %v1157_v41, %v1635_v63 }
 0x198   : > { %v746_v43 = vadd.f32 %v1635_v63, %v745_v42  ;;  %v826_v24 = vadd.f32 %v1635_v63, %v825_v23 }
 0x19a   : > { %912 = vxpose.xlu1.b32.cont [7/16] (narrow) %v826_v24, 8  ;;  %880 = vxpose.xlu0.b32.cont [7/16] (narrow) %v746_v43, 8 }
 0x19e   : > { %913 = vxpose.xlu1.b32.cont [8/16] (narrow) %v831_v45, 8  ;;  %881 = vxpose.xlu0.b32.cont [8/16] (narrow) %v751_v44, 8 }
 0x1a6   : > { %v1136_v46 = vpop.f32.mrb[8].mxu0  ;;  %v1160_v11 = vpop.f32.mrb[8].mxu1 }
 0x1a7   : > { %v755_v47 = vpop.f32.mrb[9].mxu0  ;;  %v835_v25 = vpop.f32.mrb[9].mxu1  ;;  %v761_v48 = vadd.f32 %v1136_v46, %v1635_v63  ;;  %v841_v49 = vadd.f32 %v1160_v11, %v1635_v63 }
 0x1a8   : > { %v756_v26 = vadd.f32 %v1635_v63, %v755_v47  ;;  %v836_v12 = vadd.f32 %v1635_v63, %v835_v25 }
 0x1aa   : > { %914 = vxpose.xlu1.b32.cont [9/16] (narrow) %v836_v12, 8  ;;  %882 = vxpose.xlu0.b32.cont [9/16] (narrow) %v756_v26, 8 }
 0x1ae   : > { %915 = vxpose.xlu1.b32.cont [10/16] (narrow) %v841_v49, 8  ;;  %883 = vxpose.xlu0.b32.cont [10/16] (narrow) %v761_v48, 8 }
 0x1b6   : > { %v1139_v50 = vpop.f32.mrb[10].mxu0  ;;  %v1163_v51 = vpop.f32.mrb[10].mxu1 }
 0x1b7   : > { %v765_v52 = vpop.f32.mrb[11].mxu0  ;;  %v845_v27 = vpop.f32.mrb[11].mxu1  ;;  %v771_v14 = vadd.f32 %v1139_v50, %v1635_v63  ;;  %v851_v53 = vadd.f32 %v1163_v51, %v1635_v63 }
 0x1b8   : > { %v766_v13 = vadd.f32 %v1635_v63, %v765_v52  ;;  %v846_v28 = vadd.f32 %v1635_v63, %v845_v27 }
 0x1ba   : > { %916 = vxpose.xlu1.b32.cont [11/16] (narrow) %v846_v28, 8  ;;  %884 = vxpose.xlu0.b32.cont [11/16] (narrow) %v766_v13, 8 }
 0x1be   : > { %917 = vxpose.xlu1.b32.cont [12/16] (narrow) %v851_v53, 8  ;;  %885 = vxpose.xlu0.b32.cont [12/16] (narrow) %v771_v14, 8 }
 0x1c6   : > { %v1142_v54 = vpop.f32.mrb[12].mxu0  ;;  %v1166_v55 = vpop.f32.mrb[12].mxu1 }
 0x1c7   : > { %v775_v56 = vpop.f32.mrb[13].mxu0  ;;  %v855_v29 = vpop.f32.mrb[13].mxu1  ;;  %v781_v58 = vadd.f32 %v1142_v54, %v1635_v63  ;;  %v861_v15 = vadd.f32 %v1166_v55, %v1635_v63 }
 0x1c8   : > { %v776_v30 = vadd.f32 %v1635_v63, %v775_v56  ;;  %v856_v57 = vadd.f32 %v1635_v63, %v855_v29 }
 0x1ca   : > { %918 = vxpose.xlu1.b32.cont [13/16] (narrow) %v856_v57, 8  ;;  %886 = vxpose.xlu0.b32.cont [13/16] (narrow) %v776_v30, 8 }
 0x1ce   : > { %919 = vxpose.xlu1.b32.cont [14/16] (narrow) %v861_v15, 8  ;;  %887 = vxpose.xlu0.b32.cont [14/16] (narrow) %v781_v58, 8 }
 0x1d6   : > { %v1145_v59 = vpop.f32.mrb[14].mxu0  ;;  %v1169_v16 = vpop.f32.mrb[14].mxu1 }
 0x1d7   : > { %v785_v60 = vpop.f32.mrb[15].mxu0  ;;  %v865_v31 = vpop.f32.mrb[15].mxu1  ;;  %v791_v62 = vadd.f32 %v1145_v59, %v1635_v63  ;;  %v871_v0 = vadd.f32 %v1169_v16, %v1635_v63 }
 0x1d8   : > { %v786_v61 = vadd.f32 %v1635_v63, %v785_v60  ;;  %v866_v32 = vadd.f32 %v1635_v63, %v865_v31 }
 0x1da   : > { %920 = vxpose.xlu1.b32.cont [15/16] (narrow) %v866_v32, 8  ;;  %888 = vxpose.xlu0.b32.cont [15/16] (narrow) %v786_v61, 8 }
 0x1de   : > { %921 = vxpose.xlu1.b32.end [16/16] (narrow) %v871_v0, 8  ;;  %889 = vxpose.xlu0.b32.end [16/16] (narrow) %v791_v62, 8 }
 0x222   : > { %v922_v33 = vpop.trf.xlu1  ;;  %v890_v17 = vpop.trf.xlu0 }
 0x223   : > { %939 = vst [vmem:[%s206_s10 + $0x8] sm:$0xff] %v922_v33  ;;  %938 = vst [vmem:[%s206_s10] sm:$0xff] %v890_v17 }
 0x224 PF: > { %s13_s14 = sadd.s32 1, %s1233_s14   ;;  %s1686_s12 = smov %s1229_s13 }
 0x225   : > { %p10_p5 = scmp.ge.s32.totalorder %s13_s14, 4   ;;  %s1687_s13 = smov %s1689_s15 }
 0x227   :  { %12 = sbr.rel (!%p10_p5) target bundleno = 2 (0x2), region = 62 }

</bundles_post_ra>
